<compile_context>
chip_gen: v5e
topology: v5e:2x2
jax: 0.10.0
libtpu: 0.0.40
codegen_flags: <defaults>
</compile_context>

<pallas_src>
import functools

import jax
import jax.numpy as jnp
from jax.experimental import pallas as pl
from jax.experimental.pallas import tpu as pltpu

_LANE = 128
_SUBLANE = 8


def _round_up(x, m):
    return (x + m - 1) // m * m


def _is_v5e():
    try:
        kind = jax.devices()[0].device_kind.lower()
    except Exception:
        return False
    return ("v5 lite" in kind) or ("v5e" in kind) or ("v5litepod" in kind)


def _matmul_bias_silu_kernel(p_ref, w_ref, b_ref, o_ref):
    """One (batch, C2-tile, M-tile) step.

    p_ref: (1, TM, Kp)   bf16 K-packed im2col patches
    w_ref: (Kp, TC2)     bf16 weights (BN scale pre-folded)
    b_ref: (1, TC2)      f32  folded BN bias
    o_ref: (1, TM, TC2)  output tile
    """
    acc = jnp.dot(p_ref[0], w_ref[...], preferred_element_type=jnp.float32)
    y = acc + b_ref[...]
    # SiLU: y * sigmoid(y); exp and the approx reciprocal both use the EUP slot.
    y = y * pl.reciprocal(1.0 + jnp.exp(-y), approx=True)
    o_ref[0] = y.astype(o_ref.dtype)


def conv_block(x, weight, gamma, beta, running_mean, running_var, *,
               k=3, s=1, eps=1e-3, data_format="NCHW", out_dtype=None,
               keep_padded_nhwc=False, compute_dtype=jnp.bfloat16):
    """ConvBlock forward (eval-mode BN).

    x:      (N, C1, H, W) if data_format == "NCHW", else (N, H, W, C1)
    weight: (C2, C1, k, k)  -- PyTorch Conv2d weight layout
    returns (N, C2, Ho, Wo) (or padded NHWC if keep_padded_nhwc=True).
    """
    if data_format == "NCHW":
        N, C1, H, W = x.shape
        x_nhwc = jnp.transpose(x, (0, 2, 3, 1))
    elif data_format == "NHWC":
        N, H, W, C1 = x.shape
        x_nhwc = x
    else:
        raise ValueError(f"unknown data_format {data_format!r}")
    C2 = weight.shape[0]
    if out_dtype is None:
        out_dtype = x.dtype

    pad = k // 2                               # matches nn.Conv2d(padding=k//2)
    Ho = (H + 2 * pad - k) // s + 1
    Wo = (W + 2 * pad - k) // s + 1
    M = Ho * Wo

    KK = k * k * C1
    Kp = _round_up(KK, _LANE)
    C2p = _round_up(C2, _LANE)

    # ---- BN folding (eval semantics): scale -> weights, bias stays --------
    scale = (gamma.astype(jnp.float32) /
             jnp.sqrt(running_var.astype(jnp.float32) + eps))
    bias = beta.astype(jnp.float32) - running_mean.astype(jnp.float32) * scale

    w_hwio = jnp.transpose(weight, (2, 3, 1, 0)).astype(jnp.float32)  # (k,k,C1,C2)
    w_hwio = w_hwio * scale[None, None, None, :]
    w2d = w_hwio.reshape(KK, C2)
    w2d = jnp.pad(w2d, ((0, Kp - KK), (0, C2p - C2))).astype(compute_dtype)
    bias_p = jnp.pad(bias, (0, C2p - C2)).reshape(1, C2p)

    # ---- wrapper im2col: K packed once, no per-tap 128-channel padding ----
    # (K ordering is (dy, dx, c), matching w_hwio.reshape(k*k*C1, C2).)
    x_pad = jnp.pad(x_nhwc, ((0, 0), (pad, pad), (pad, pad), (0, 0)))
    x_pad = x_pad.astype(compute_dtype)
    taps = []
    for dy in range(k):
        for dx in range(k):
            taps.append(x_pad[:, dy:dy + s * (Ho - 1) + 1:s,
                              dx:dx + s * (Wo - 1) + 1:s, :])
    patches = taps[0] if len(taps) == 1 else jnp.concatenate(taps, axis=-1)
    patches = patches.reshape(N, M, KK)

    # ---- tiling ------------------------------------------------------------
    tc2 = 128 if _is_v5e() else 256            # 256-wide MXU on v6e/v7x
    if C2p % tc2:
        tc2 = _LANE
    tc2 = min(tc2, C2p)
    n_c2 = C2p // tc2

    tm = min(512, _round_up(M, _SUBLANE))      # sublane-aligned, ~512-row target
    Mp = _round_up(M, tm)
    n_m = Mp // tm
    # v7x megacore: make sure there are at least 2 parallel grid steps.
    if N * n_c2 * n_m < 2 and Mp >= 2 * _SUBLANE:
        tm = _round_up(Mp // 2, _SUBLANE)
        Mp = _round_up(M, tm)
        n_m = Mp // tm

    patches = jnp.pad(patches, ((0, 0), (0, Mp - M), (0, Kp - KK)))

    out_itemsize = jnp.dtype(out_dtype).itemsize
    vmem_bytes = (2 * (tm * Kp + Kp * tc2) * 2      # double-buffered bf16 inputs
                  + 2 * tm * tc2 * out_itemsize     # double-buffered output
                  + 2 * tm * tc2 * 4)               # f32 acc + epilogue temps
    vmem_limit = int(min(max(int(1.5 * vmem_bytes) + (4 << 20), 32 << 20),
                         64 << 20))

    out_flat = pl.pallas_call(
        _matmul_bias_silu_kernel,
        out_shape=jax.ShapeDtypeStruct((N, Mp, C2p), out_dtype),
        grid_spec=pltpu.PrefetchScalarGridSpec(
            num_scalar_prefetch=0,
            grid=(N, n_c2, n_m),       # M innermost -> weight block stays resident
            in_specs=[
                pl.BlockSpec((1, tm, Kp), lambda n, c, m: (n, m, 0)),
                pl.BlockSpec((Kp, tc2), lambda n, c, m: (0, c)),
                pl.BlockSpec((1, tc2), lambda n, c, m: (0, c)),
            ],
            out_specs=pl.BlockSpec((1, tm, tc2), lambda n, c, m: (n, m, c)),
        ),
        compiler_params=pltpu.CompilerParams(
            dimension_semantics=("parallel", "parallel", "parallel"),
            vmem_limit_bytes=vmem_limit),
    )(patches, w2d, bias_p)

    if keep_padded_nhwc:
        # Lane-dense NHWC output with padded channels, for fusing straight into
        # the next layer without extra HBM passes.
        return out_flat[:, :M, :].reshape(N, Ho, Wo, C2p)
    out = out_flat[:, :M, :C2].reshape(N, Ho, Wo, C2)
    if data_format == "NCHW":
        out = jnp.transpose(out, (0, 3, 1, 2))
    return out


if __name__ == "__main__":
    # Small, deterministic config: ConvBlock(c1=4, c2=8, k=3, s=1)
    N, C1, H, W = 2, 4, 16, 16
    C2, K, S = 8, 3, 1

    key = jax.random.PRNGKey(0)
    k_x, k_w, k_g, k_b, k_m, k_v = jax.random.split(key, 6)

    x = jax.random.normal(k_x, (N, C1, H, W), dtype=jnp.float32)
    weight = jax.random.normal(k_w, (C2, C1, K, K), dtype=jnp.float32) * 0.1
    gamma = 1.0 + 0.1 * jax.random.normal(k_g, (C2,), dtype=jnp.float32)
    beta = 0.1 * jax.random.normal(k_b, (C2,), dtype=jnp.float32)
    running_mean = 0.1 * jax.random.normal(k_m, (C2,), dtype=jnp.float32)
    running_var = jnp.abs(jax.random.normal(k_v, (C2,), dtype=jnp.float32)) + 0.5

    fn = jax.jit(functools.partial(conv_block, k=K, s=S, eps=1e-3))
    out = fn(x, weight, gamma, beta, running_mean, running_var)
    jax.block_until_ready(out)

    # sanity check against a pure-JAX f32 reference (tolerance relaxed for the
    # bf16 matmul operands; accumulation is f32)
    ref = jax.lax.conv_general_dilated(
        x, weight, window_strides=(S, S), padding=[(K // 2, K // 2)] * 2,
        dimension_numbers=("NCHW", "OIHW", "NCHW"))
    sc = gamma / jnp.sqrt(running_var + 1e-3)
    ref = ref * sc[None, :, None, None] + \
        (beta - running_mean * sc)[None, :, None, None]
    ref = ref * jax.nn.sigmoid(ref)
    assert jnp.allclose(out, ref, atol=2e-2, rtol=2e-2), \
        float(jnp.max(jnp.abs(out - ref)))

    print("KERNEL_OK")
</pallas_src>

<mosaic_0001>
module attributes {stable_mosaic.version = 11 : i64} {
  func.func @_matmul_bias_silu_kernel(%arg0: i32, %arg1: i32, %arg2: i32, %arg3: memref<1x256x128xbf16, #tpu.memory_space<vmem>>, %arg4: memref<128x128xbf16, #tpu.memory_space<vmem>>, %arg5: memref<1x128xf32, #tpu.memory_space<vmem>>, %arg6: memref<1x256x128xf32, #tpu.memory_space<vmem>>) attributes {dimension_semantics = [#tpu.dimension_semantics<parallel>, #tpu.dimension_semantics<parallel>, #tpu.dimension_semantics<parallel>], iteration_bounds = array<i64: 2, 1, 1>, scalar_prefetch = 0 : i64, scratch_operands = 0 : i64, tpu.core_type = #tpu.core_type<tc>, window_params = [{transform_indices = @transform_0, window_bounds = array<i64: 1, 256, 128>}, {transform_indices = @transform_1, window_bounds = array<i64: 128, 128>}, {transform_indices = @transform_2, window_bounds = array<i64: 1, 128>}, {transform_indices = @transform_3, window_bounds = array<i64: 1, 256, 128>}]} {
    %c0 = arith.constant 0 : index
    %c0_0 = arith.constant 0 : index
    %c0_1 = arith.constant 0 : index
    %0 = vector.load %arg3[%c0, %c0_0, %c0_1] : memref<1x256x128xbf16, #tpu.memory_space<vmem>>, vector<1x256x128xbf16>
    %1 = vector.shape_cast %0 : vector<1x256x128xbf16> to vector<256x128xbf16>
    %c0_2 = arith.constant 0 : index
    %c0_3 = arith.constant 0 : index
    %2 = vector.load %arg4[%c0_2, %c0_3] : memref<128x128xbf16, #tpu.memory_space<vmem>>, vector<128x128xbf16>
    %cst = arith.constant dense<0.000000e+00> : vector<256x128xf32>
    %3 = tpu.matmul %1, %2, %cst {dimension_numbers = #tpu.dot_dimension_numbers<[1], [0], [0], [1], [0, 0, 1, 1], [], []>} : vector<256x128xbf16>, vector<128x128xbf16>, vector<256x128xf32> -> vector<256x128xf32>
    %c0_4 = arith.constant 0 : index
    %c0_5 = arith.constant 0 : index
    %4 = vector.load %arg5[%c0_4, %c0_5] : memref<1x128xf32, #tpu.memory_space<vmem>>, vector<1x128xf32>
    %5 = vector.broadcast %4 : vector<1x128xf32> to vector<256x128xf32>
    %6 = arith.addf %3, %5 : vector<256x128xf32>
    %cst_6 = arith.constant 0.000000e+00 : f32
    %7 = vector.broadcast %cst_6 : f32 to vector<256x128xf32>
    %8 = arith.subf %7, %6 : vector<256x128xf32>
    %9 = math.exp %8 : vector<256x128xf32>
    %cst_7 = arith.constant 1.000000e+00 : f32
    %10 = vector.broadcast %cst_7 : f32 to vector<256x128xf32>
    %11 = arith.addf %10, %9 : vector<256x128xf32>
    %12 = tpu.reciprocal %11 {approx = true} : vector<256x128xf32> -> vector<256x128xf32>
    %13 = arith.mulf %6, %12 : vector<256x128xf32>
    %c0_8 = arith.constant 0 : index
    %c0_9 = arith.constant 0 : index
    %c0_10 = arith.constant 0 : index
    %14 = vector.load %arg6[%c0_8, %c0_9, %c0_10] : memref<1x256x128xf32, #tpu.memory_space<vmem>>, vector<1x256x128xf32>
    %15 = vector.shape_cast %14 : vector<1x256x128xf32> to vector<256x128xf32>
    %16 = vector.shape_cast %13 : vector<256x128xf32> to vector<1x256x128xf32>
    tpu.vector_store %arg6[%c0_8, %c0_9, %c0_10], %16 {strides = array<i32>} : memref<1x256x128xf32, #tpu.memory_space<vmem>>, vector<1x256x128xf32>,
    return
  }
  func.func @transform_0(%arg0: i32, %arg1: i32, %arg2: i32) -> (i32, i32, i32) {
    %c0_i32 = arith.constant 0 : i32
    %c0_i32_0 = arith.constant 0 : i32
    return %arg0, %arg2, %c0_i32 : i32, i32, i32
  }
  func.func @transform_1(%arg0: i32, %arg1: i32, %arg2: i32) -> (i32, i32) {
    %c0_i32 = arith.constant 0 : i32
    %c0_i32_0 = arith.constant 0 : i32
    return %c0_i32, %arg1 : i32, i32
  }
  func.func @transform_2(%arg0: i32, %arg1: i32, %arg2: i32) -> (i32, i32) {
    %c0_i32 = arith.constant 0 : i32
    %c0_i32_0 = arith.constant 0 : i32
    return %c0_i32, %arg1 : i32, i32
  }
  func.func @transform_3(%arg0: i32, %arg1: i32, %arg2: i32) -> (i32, i32, i32) {
    %c0_i32 = arith.constant 0 : i32
    return %arg0, %arg2, %arg1 : i32, i32, i32
  }
}

</mosaic_0001>

<bundles_post_ra>
// kernel: conv_block.1
= control target key start
LH: loop header
LB: loop body
LE: loop exit
PB: predicated region body
PF: predicated region fallthrough
CT: control target
= control target key end

     0   :  { %s1248_s12 = smov 0   ;;  %s1250_s13 = smov 0   ;;  %s1526_s0 = inlined_call_operand.vmem [shape: bf16[2,256,128], index: 0, kind: input, shape index: {}]   ;;  %s1527_s1 = inlined_call_operand.vmem [shape: bf16[128,128], index: 1, kind: input, shape index: {}]   ;;  %s1528_s2 = inlined_call_operand.vmem [shape: f32[1,128], index: 2, kind: input, shape index: {}]   ;;  %s1529_s3 = inlined_call_operand.vmem [shape: f32[2,256,128], index: 3, kind: output, shape index: {}]  }
   0x1   :  { %s1252_s14 = smov 0  }
   0x2 LB: > { %s32_s15 = sadd.s32 1, %s1222_s13  ;;  %p898_p0 = scmp.ge.s32.totalorder %s1226_s14, 1  ;;  %s1226_s14 = sphi %s1252_s14, %s13_s14   ;;  %s1222_s13 = sphi %s1250_s13, %s1531_s13   ;;  %s1218_s12 = sphi %s1248_s12, %s1530_s12  }
   0x3   : > { %p34_p1 = scmp.ge.s32.totalorder %s32_s15, 2  ;;  %p184_p2 = scmp.lt.s32.totalorder %s1226_s14, 3 }
   0x5   : > { %s1533_s15 = smov (%p34_p1, %s32_s15), 0  ;;  %p185_p3 = pnand %p898_p0, %p184_p2 }
   0x6   : > { %p227_p4 = scmp.lt.s32.totalorder (!%p185_p3), %s1218_s12, 1 }
   0x7   : > { %188 = sbr.rel (%p185_p3) target bundleno = 265 (0x109), region = 32 }
   0xc   : > { %v1026_v0 = vld [vmem:[%s1527_s1 + $0x38] sm:$0xff]  ;;  %v1025_v1 = vld [vmem:[%s1527_s1 + $0x30] sm:$0xff]  ;;  %v1024_v2 = vld [vmem:[%s1527_s1 + $0x28] sm:$0xff]  ;;  %s1535_s12 = smov (!%p227_p4, %s1218_s12), 1 }
   0xd   : > { %452 = vmatpush.bf16.msra.mxu0 %v1026_v0  ;;  %1027 = vmatpush.bf16.msra.mxu1 %v1026_v0  ;;  %v1023_v3 = vld [vmem:[%s1527_s1 + $0x20] sm:$0xff]  ;;  %v1022_v4 = vld [vmem:[%s1527_s1 + $0x18] sm:$0xff]  ;;  %v1021_v5 = vld [vmem:[%s1527_s1 + $0x10] sm:$0xff]  ;;  %s1001_s30 = sshll.u32 %s1535_s12, 7  ;;  %s1002_s11 = sshll.u32 %s1535_s12, 8 }
   0xe   : > { %1028 = vmatpush.bf16.msra.mxu2 %v1026_v0  ;;  %1029 = vmatpush.bf16.msra.mxu3 %v1026_v0  ;;  %v1020_v6 = vld [vmem:[%s1527_s1 + $0x8] sm:$0xff]  ;;  %v1019_v7 = vld [vmem:[%s1527_s1] sm:$0xff]  ;;  %s1300_s8 = scalar_lea.vmem %s1526_s0, %s1001_s30  ;;  %s1364_s18 = scalar_lea.vmem %s1529_s3, %s1002_s11 }
   0xf   : > { %v1003_v8 = vld [vmem:[%s1300_s8] sm:$0xff]  ;;  %v1004_v12 = vld [vmem:[%s1300_s8 + $0x8] sm:$0xff]  ;;  %v1005_v16 = vld [vmem:[%s1300_s8 + $0x10] sm:$0xff] }
  0x10   : > { %v1007_v9 = vld [vmem:[%s1300_s8 + $0x20] sm:$0xff]  ;;  %v1008_v13 = vld [vmem:[%s1300_s8 + $0x28] sm:$0xff]  ;;  %v1009_v17 = vld [vmem:[%s1300_s8 + $0x30] sm:$0xff] }
  0x11   : > { %453 = vmatpush.bf16.msra.mxu0 %v1025_v1  ;;  %1030 = vmatpush.bf16.msra.mxu1 %v1025_v1  ;;  %v1011_v10 = vld [vmem:[%s1300_s8 + $0x40] sm:$0xff]  ;;  %v1012_v14 = vld [vmem:[%s1300_s8 + $0x48] sm:$0xff]  ;;  %v1013_v18 = vld [vmem:[%s1300_s8 + $0x50] sm:$0xff] }
  0x12   : > { %1031 = vmatpush.bf16.msra.mxu2 %v1025_v1  ;;  %1032 = vmatpush.bf16.msra.mxu3 %v1025_v1  ;;  %v1015_v11 = vld [vmem:[%s1300_s8 + $0x60] sm:$0xff]  ;;  %v1016_v15 = vld [vmem:[%s1300_s8 + $0x68] sm:$0xff]  ;;  %v1017_v19 = vld [vmem:[%s1300_s8 + $0x70] sm:$0xff] }
  0x13   : > { %v1006_v20 = vld [vmem:[%s1300_s8 + $0x18] sm:$0xff]  ;;  %v1321_v24 = vld [vmem:[%s1528_s2] ss:$0 sm:$0xff] }
  0x14   : > { %v1010_v21 = vld [vmem:[%s1300_s8 + $0x38] sm:$0xff] }
  0x15   : > { %454 = vmatpush.bf16.msra.mxu0 %v1024_v2  ;;  %1033 = vmatpush.bf16.msra.mxu1 %v1024_v2  ;;  %v1014_v22 = vld [vmem:[%s1300_s8 + $0x58] sm:$0xff] }
  0x16   : > { %1034 = vmatpush.bf16.msra.mxu2 %v1024_v2  ;;  %1035 = vmatpush.bf16.msra.mxu3 %v1024_v2  ;;  %v1018_v23 = vld [vmem:[%s1300_s8 + $0x78] sm:$0xff] }
  0x19   : > { %455 = vmatpush.bf16.msra.mxu0 %v1023_v3  ;;  %1036 = vmatpush.bf16.msra.mxu1 %v1023_v3 }
  0x1a   : > { %1037 = vmatpush.bf16.msra.mxu2 %v1023_v3  ;;  %1038 = vmatpush.bf16.msra.mxu3 %v1023_v3 }
  0x1d   : > { %456 = vmatpush.bf16.msra.mxu0 %v1022_v4  ;;  %1039 = vmatpush.bf16.msra.mxu1 %v1022_v4 }
  0x1e   : > { %1040 = vmatpush.bf16.msra.mxu2 %v1022_v4  ;;  %1041 = vmatpush.bf16.msra.mxu3 %v1022_v4 }
  0x21   : > { %457 = vmatpush.bf16.msra.mxu0 %v1021_v5  ;;  %1042 = vmatpush.bf16.msra.mxu1 %v1021_v5 }
  0x22   : > { %1043 = vmatpush.bf16.msra.mxu2 %v1021_v5  ;;  %1044 = vmatpush.bf16.msra.mxu3 %v1021_v5 }
  0x25   : > { %458 = vmatpush.bf16.msra.mxu0 %v1020_v6  ;;  %1045 = vmatpush.bf16.msra.mxu1 %v1020_v6 }
  0x26   : > { %1046 = vmatpush.bf16.msra.mxu2 %v1020_v6  ;;  %1047 = vmatpush.bf16.msra.mxu3 %v1020_v6 }
  0x29   : > { %459 = vmatpush.bf16.msra.mxu0 %v1019_v7  ;;  %1048 = vmatpush.bf16.msra.mxu1 %v1019_v7 }
  0x2a   : > { %1049 = vmatpush.bf16.msra.mxu2 %v1019_v7  ;;  %1050 = vmatpush.bf16.msra.mxu3 %v1019_v7 }
  0x2c   : > { %460 = vmatmul.bf16.vlgmr.msra.gmra.mxu0 %v1003_v8  ;;  %480 = vmatmul.bf16.vlgmr.msra.gmra.mxu1 %v1007_v9 }
  0x2d   : > { %500 = vmatmul.bf16.vlgmr.msra.gmra.mxu2 %v1011_v10  ;;  %520 = vmatmul.bf16.vlgmr.msra.gmra.mxu3 %v1015_v11 }
  0x3c   : > { %465 = vmatmul.bf16.gmra.mxu0 %v1004_v12  ;;  %485 = vmatmul.bf16.gmra.mxu1 %v1008_v13 }
  0x3d   : > { %505 = vmatmul.bf16.gmra.mxu2 %v1012_v14  ;;  %525 = vmatmul.bf16.gmra.mxu3 %v1016_v15 }
  0x4c   : > { %470 = vmatmul.bf16.gmra.mxu0 %v1005_v16  ;;  %490 = vmatmul.bf16.gmra.mxu1 %v1009_v17 }
  0x4d   : > { %510 = vmatmul.bf16.gmra.mxu2 %v1013_v18  ;;  %530 = vmatmul.bf16.gmra.mxu3 %v1017_v19 }
  0x5c   : > { %475 = vmatmul.bf16.gmra.mxu0 %v1006_v20  ;;  %495 = vmatmul.bf16.gmra.mxu1 %v1010_v21 }
  0x5d   : > { %515 = vmatmul.bf16.gmra.mxu2 %v1014_v22  ;;  %535 = vmatmul.bf16.gmra.mxu3 %v1018_v23 }
  0xa9   : > { %v461_v25 = vpop.f32.mrf.mxu0  ;;  %v481_v26 = vpop.f32.mrf.mxu1 }
  0xaa   : > { %v462_v27 = vadd.f32 %v1321_v24, %v461_v25  ;;  %v1325_v28 = vadd.f32 %v1321_v24, %v481_v26 }
  0xac   : > { %v541_v29 = vsub.f32 0.0, %v462_v27  ;;  %v549_v30 = vsub.f32 0.0, %v1325_v28 }
  0xae   : > { %v573_v31 = vmul.f32 1.442695, %v541_v29  ;;  %v589_v32 = vmul.f32 1.442695, %v549_v30 }
  0xb0   : > { %1076 = vpow2.f32 %v573_v31  ;;  %v501_v33 = vpop.f32.mrf.mxu2  ;;  %v521_v34 = vpop.f32.mrf.mxu3 }
  0xb1   : > { %1078 = vpow2.f32 %v589_v32  ;;  %v1329_v35 = vadd.f32 %v1321_v24, %v501_v33  ;;  %v1332_v36 = vadd.f32 %v1321_v24, %v521_v34  ;;  %v463_v37 = vpop.f32.mrf.mxu0  ;;  %v483_v38 = vpop.f32.mrf.mxu1 }
  0xb2   : > { %v1335_v39 = vadd.f32 %v1321_v24, %v463_v37  ;;  %v1338_v40 = vadd.f32 %v1321_v24, %v483_v38 }
  0xb3   : > { %v557_v41 = vsub.f32 0.0, %v1329_v35  ;;  %v565_v42 = vsub.f32 0.0, %v1332_v36 }
  0xb4   : > { %v542_v43 = vsub.f32 0.0, %v1335_v39  ;;  %v550_v44 = vsub.f32 0.0, %v1338_v40 }
  0xb5   : > { %v605_v45 = vmul.f32 1.442695, %v557_v41  ;;  %v621_v46 = vmul.f32 1.442695, %v565_v42 }
  0xb6   : > { %v1077_v47 = vpop.eup %1076  ;;  %v575_v50 = vmul.f32 1.442695, %v542_v43  ;;  %v591_v52 = vmul.f32 1.442695, %v550_v44 }
  0xb7   : > { %v1079_v48 = vpop.eup %1078  ;;  %v637_v49 = vadd.f32 1.0, %v1077_v47  ;;  %1080 = vpow2.f32 %v605_v45 }
  0xb8   : > { %v645_v51 = vadd.f32 1.0, %v1079_v48  ;;  %1082 = vpow2.f32 %v621_v46  ;;  %v503_v53 = vpop.f32.mrf.mxu2  ;;  %v523_v54 = vpop.f32.mrf.mxu3 }
  0xb9   : > { %1084 = vrcp.f32 %v637_v49  ;;  %v1345_v55 = vadd.f32 %v1321_v24, %v503_v53  ;;  %v1348_v56 = vadd.f32 %v1321_v24, %v523_v54  ;;  %v466_v57 = vpop.f32.mrf.mxu0  ;;  %v486_v58 = vpop.f32.mrf.mxu1 }
  0xba   : > { %1086 = vrcp.f32 %v645_v51  ;;  %v1351_v59 = vadd.f32 %v1321_v24, %v466_v57  ;;  %v1354_v60 = vadd.f32 %v1321_v24, %v486_v58 }
  0xbb   : > { %1088 = vpow2.f32 %v575_v50  ;;  %v558_v61 = vsub.f32 0.0, %v1345_v55  ;;  %v566_v62 = vsub.f32 0.0, %v1348_v56 }
  0xbc   : > { %1090 = vpow2.f32 %v591_v52  ;;  %v543_v63 = vsub.f32 0.0, %v1351_v59  ;;  %v551_v0 = vsub.f32 0.0, %v1354_v60 }
  0xbd   : > { %v1081_v1 = vpop.eup %1080  ;;  %v607_v2 = vmul.f32 1.442695, %v558_v61  ;;  %v623_v5 = vmul.f32 1.442695, %v566_v62 }
  0xbe   : > { %v1083_v3 = vpop.eup %1082  ;;  %v653_v4 = vadd.f32 1.0, %v1081_v1  ;;  %v577_v8 = vmul.f32 1.442695, %v543_v63  ;;  %v593_v11 = vmul.f32 1.442695, %v551_v0 }
  0xbf   : > { %v1085_v6 = vpop.eup %1084  ;;  %v661_v7 = vadd.f32 1.0, %v1083_v3  ;;  %1092 = vpow2.f32 %v607_v2 }
  0xc0   : > { %v1087_v9 = vpop.eup %1086  ;;  %v701_v10 = vmul.f32 %v1085_v6, %v462_v27  ;;  %1094 = vrcp.f32 %v653_v4  ;;  %v506_v12 = vpop.f32.mrf.mxu2 }
  0xc1   : > { %v526_v13 = vpop.f32.mrf.mxu3  ;;  %v1089_v14 = vpop.eup %1088  ;;  %v709_v15 = vmul.f32 %v1087_v9, %v1325_v28  ;;  %1096 = vrcp.f32 %v661_v7  ;;  %v1368_v16 = vadd.f32 %v1321_v24, %v506_v12 }
  0xc2   : > { %v1371_v17 = vadd.f32 %v1321_v24, %v526_v13  ;;  %v468_v18 = vpop.f32.mrf.mxu0  ;;  %v488_v19 = vpop.f32.mrf.mxu1  ;;  %733 = vst [vmem:[%s1364_s18] sm:$0xff] %v701_v10  ;;  %v638_v21 = vadd.f32 1.0, %v1089_v14  ;;  %1098 = vpow2.f32 %v623_v5 }
  0xc3   : > { %v1091_v20 = vpop.eup %1090  ;;  %v1375_v22 = vadd.f32 %v1321_v24, %v468_v18  ;;  %v1378_v23 = vadd.f32 %v1321_v24, %v488_v19  ;;  %741 = vst [vmem:[%s1364_s18 + $0x40] sm:$0xff] %v709_v15  ;;  %1100 = vpow2.f32 %v577_v8  ;;  %v559_v26 = vsub.f32 0.0, %v1368_v16 }
  0xc4   : > { %v646_v25 = vadd.f32 1.0, %v1091_v20  ;;  %v567_v27 = vsub.f32 0.0, %v1371_v17  ;;  %1102 = vrcp.f32 %v638_v21 }
  0xc5   : > { %v544_v28 = vsub.f32 0.0, %v1375_v22  ;;  %v552_v29 = vsub.f32 0.0, %v1378_v23  ;;  %v1093_v30 = vpop.eup %1092  ;;  %v609_v31 = vmul.f32 1.442695, %v559_v26 }
  0xc6   : > { %1104 = vrcp.f32 %v646_v25  ;;  %v625_v32 = vmul.f32 1.442695, %v567_v27  ;;  %v1095_v33 = vpop.eup %1094  ;;  %v654_v34 = vadd.f32 1.0, %v1093_v30 }
  0xc7   : > { %1106 = vpow2.f32 %v593_v11  ;;  %v579_v37 = vmul.f32 1.442695, %v544_v28  ;;  %v1097_v38 = vpop.eup %1096  ;;  %v717_v41 = vmul.f32 %v1095_v33, %v1329_v35  ;;  %v595_v44 = vmul.f32 1.442695, %v552_v29 }
  0xc8   : > { %1108 = vpow2.f32 %v609_v31  ;;  %v1099_v42 = vpop.eup %1098  ;;  %v725_v43 = vmul.f32 %v1097_v38, %v1332_v36  ;;  %v508_v45 = vpop.f32.mrf.mxu2 }
  0xc9   : > { %1110 = vrcp.f32 %v654_v34  ;;  %v528_v46 = vpop.f32.mrf.mxu3  ;;  %v1101_v47 = vpop.eup %1100  ;;  %749 = vst [vmem:[%s1364_s18 + $0x80] sm:$0xff] %v717_v41  ;;  %v662_v48 = vadd.f32 1.0, %v1099_v42  ;;  %v1389_v49 = vadd.f32 %v1321_v24, %v508_v45 }
  0xca   : > { %1112 = vpow2.f32 %v625_v32  ;;  %v1392_v50 = vadd.f32 %v1321_v24, %v528_v46  ;;  %v471_v35 = vpop.f32.mrf.mxu0  ;;  %v491_v51 = vpop.f32.mrf.mxu1  ;;  %757 = vst [vmem:[%s1364_s18 + $0xc0] sm:$0xff] %v725_v43  ;;  %v639_v36 = vadd.f32 1.0, %v1101_v47 }
  0xcb   : > { %v1103_v52 = vpop.eup %1102  ;;  %1114 = vpow2.f32 %v579_v37  ;;  %v1396_v53 = vadd.f32 %v1321_v24, %v471_v35  ;;  %v1399_v54 = vadd.f32 %v1321_v24, %v491_v51  ;;  %v560_v61 = vsub.f32 0.0, %v1389_v49 }
  0xcc   : > { %v1105_v57 = vpop.eup %1104  ;;  %v702_v58 = vmul.f32 %v1103_v52, %v1335_v39  ;;  %1116 = vrcp.f32 %v662_v48  ;;  %v568_v62 = vsub.f32 0.0, %v1392_v50 }
  0xcd   : > { %v1107_v63 = vpop.eup %1106  ;;  %v710_v0 = vmul.f32 %v1105_v57, %v1338_v40  ;;  %1118 = vrcp.f32 %v639_v36  ;;  %v545_v1 = vsub.f32 0.0, %v1396_v53  ;;  %v553_v2 = vsub.f32 0.0, %v1399_v54 }
  0xce   : > { %v1109_v3 = vpop.eup %1108  ;;  %734 = vst [vmem:[%s1364_s18 + $0x8] sm:$0xff] %v702_v58  ;;  %v647_v4 = vadd.f32 1.0, %v1107_v63  ;;  %1120 = vpow2.f32 %v595_v44  ;;  %v611_v5 = vmul.f32 1.442695, %v560_v61  ;;  %v627_v9 = vmul.f32 1.442695, %v568_v62 }
  0xcf   : > { %v1111_v39 = vpop.eup %1110  ;;  %742 = vst [vmem:[%s1364_s18 + $0x48] sm:$0xff] %v710_v0  ;;  %v655_v6 = vadd.f32 1.0, %v1109_v3  ;;  %v581_v11 = vmul.f32 1.442695, %v545_v1  ;;  %v597_v12 = vmul.f32 1.442695, %v553_v2 }
  0xd0   : > { %v1113_v7 = vpop.eup %1112  ;;  %v718_v8 = vmul.f32 %v1111_v39, %v1345_v55  ;;  %1122 = vrcp.f32 %v647_v4  ;;  %v511_v13 = vpop.f32.mrf.mxu2 }
  0xd1   : > { %v1115_v40 = vpop.eup %1114  ;;  %1124 = vrcp.f32 %v655_v6  ;;  %v663_v10 = vadd.f32 1.0, %v1113_v7  ;;  %v531_v14 = vpop.f32.mrf.mxu3  ;;  %v1412_v19 = vadd.f32 %v1321_v24, %v511_v13 }
  0xd2   : > { %v1117_v15 = vpop.eup %1116  ;;  %750 = vst [vmem:[%s1364_s18 + $0x88] sm:$0xff] %v718_v8  ;;  %v640_v18 = vadd.f32 1.0, %v1115_v40  ;;  %1126 = vpow2.f32 %v611_v5  ;;  %v1415_v20 = vadd.f32 %v1321_v24, %v531_v14  ;;  %v473_v55 = vpop.f32.mrf.mxu0 }
  0xd3   : > { %v493_v21 = vpop.f32.mrf.mxu1  ;;  %v1119_v25 = vpop.eup %1118  ;;  %v726_v26 = vmul.f32 %v1117_v15, %v1348_v56  ;;  %1128 = vrcp.f32 %v663_v10  ;;  %v1419_v27 = vadd.f32 %v1321_v24, %v473_v55  ;;  %v561_v31 = vsub.f32 0.0, %v1412_v19 }
  0xd4   : > { %v1422_v28 = vadd.f32 %v1321_v24, %v493_v21  ;;  %v1121_v29 = vpop.eup %1120  ;;  %v703_v30 = vmul.f32 %v1119_v25, %v1351_v59  ;;  %1130 = vrcp.f32 %v640_v18  ;;  %v569_v32 = vsub.f32 0.0, %v1415_v20 }
  0xd5   : > { %758 = vst [vmem:[%s1364_s18 + $0xc8] sm:$0xff] %v726_v26  ;;  %v648_v33 = vadd.f32 1.0, %v1121_v29  ;;  %1132 = vpow2.f32 %v627_v9  ;;  %v546_v56 = vsub.f32 0.0, %v1419_v27  ;;  %v613_v38 = vmul.f32 1.442695, %v561_v31 }
  0xd6   : > { %v554_v34 = vsub.f32 0.0, %v1422_v28  ;;  %v1123_v37 = vpop.eup %1122  ;;  %735 = vst [vmem:[%s1364_s18 + $0x10] sm:$0xff] %v703_v30  ;;  %1134 = vpow2.f32 %v581_v11  ;;  %v629_v41 = vmul.f32 1.442695, %v569_v32 }
  0xd7   : > { %v1125_v59 = vpop.eup %1124  ;;  %v711_v42 = vmul.f32 %v1123_v37, %v1354_v60  ;;  %1136 = vrcp.f32 %v648_v33  ;;  %v583_v45 = vmul.f32 1.442695, %v546_v56 }
  0xd8   : > { %v1127_v43 = vpop.eup %1126  ;;  %v719_v44 = vmul.f32 %v1125_v59, %v1368_v16  ;;  %1138 = vpow2.f32 %v597_v12  ;;  %v599_v48 = vmul.f32 1.442695, %v554_v34  ;;  %v513_v35 = vpop.f32.mrf.mxu2 }
  0xd9   : > { %v1129_v46 = vpop.eup %1128  ;;  %743 = vst [vmem:[%s1364_s18 + $0x50] sm:$0xff] %v711_v42  ;;  %v656_v47 = vadd.f32 1.0, %v1127_v43  ;;  %1140 = vpow2.f32 %v613_v38  ;;  %v533_v51 = vpop.f32.mrf.mxu3  ;;  %v1437_v60 = vadd.f32 %v1321_v24, %v513_v35 }
  0xda   : > { %v1131_v52 = vpop.eup %1130  ;;  %751 = vst [vmem:[%s1364_s18 + $0x90] sm:$0xff] %v719_v44  ;;  %v727_v36 = vmul.f32 %v1129_v46, %v1371_v17  ;;  %1142 = vpow2.f32 %v629_v41  ;;  %v1440_v16 = vadd.f32 %v1321_v24, %v533_v51  ;;  %v476_v57 = vpop.f32.mrf.mxu0 }
  0xdb   : > { %v496_v58 = vpop.f32.mrf.mxu1  ;;  %v1133_v61 = vpop.eup %1132  ;;  %v704_v62 = vmul.f32 %v1131_v52, %v1375_v22  ;;  %1144 = vrcp.f32 %v656_v47  ;;  %v1444_v63 = vadd.f32 %v1321_v24, %v476_v57  ;;  %v562_v2 = vsub.f32 0.0, %v1437_v60 }
  0xdc   : > { %v1447_v0 = vadd.f32 %v1321_v24, %v496_v58  ;;  %v1135_v17 = vpop.eup %1134  ;;  %759 = vst [vmem:[%s1364_s18 + $0xd0] sm:$0xff] %v727_v36  ;;  %v664_v1 = vadd.f32 1.0, %v1133_v61  ;;  %1146 = vpow2.f32 %v583_v45  ;;  %v570_v3 = vsub.f32 0.0, %v1440_v16 }
  0xdd   : > { %v1137_v4 = vpop.eup %1136  ;;  %736 = vst [vmem:[%s1364_s18 + $0x18] sm:$0xff] %v704_v62  ;;  %v641_v5 = vadd.f32 1.0, %v1135_v17  ;;  %1148 = vpow2.f32 %v599_v48  ;;  %v547_v22 = vsub.f32 0.0, %v1444_v63  ;;  %v615_v8 = vmul.f32 1.442695, %v562_v2 }
  0xde   : > { %v555_v39 = vsub.f32 0.0, %v1447_v0  ;;  %v1139_v6 = vpop.eup %1138  ;;  %v712_v7 = vmul.f32 %v1137_v4, %v1378_v23  ;;  %1150 = vrcp.f32 %v664_v1  ;;  %v631_v12 = vmul.f32 1.442695, %v570_v3 }
  0xdf   : > { %v1141_v9 = vpop.eup %1140  ;;  %1152 = vrcp.f32 %v641_v5  ;;  %v649_v40 = vadd.f32 1.0, %v1139_v6  ;;  %v585_v15 = vmul.f32 1.442695, %v547_v22 }
  0xe0   : > { %v1143_v10 = vpop.eup %1142  ;;  %744 = vst [vmem:[%s1364_s18 + $0x58] sm:$0xff] %v712_v7  ;;  %v657_v11 = vadd.f32 1.0, %v1141_v9  ;;  %1154 = vpow2.f32 %v615_v8  ;;  %v601_v18 = vmul.f32 1.442695, %v555_v39  ;;  %v516_v55 = vpop.f32.mrf.mxu2 }
  0xe1   : > { %v1145_v13 = vpop.eup %1144  ;;  %1156 = vrcp.f32 %v649_v40  ;;  %v665_v14 = vadd.f32 1.0, %v1143_v10  ;;  %v536_v21 = vpop.f32.mrf.mxu3  ;;  %v1459_v26 = vadd.f32 %v1321_v24, %v516_v55 }
  0xe2   : > { %v1147_v25 = vpop.eup %1146  ;;  %v720_v23 = vmul.f32 %v1145_v13, %v1389_v49  ;;  %1158 = vrcp.f32 %v657_v11  ;;  %v1462_v29 = vadd.f32 %v1321_v24, %v536_v21  ;;  %v478_v30 = vpop.f32.mrf.mxu0 }
  0xe3   : > { %v498_v31 = vpop.f32.mrf.mxu1  ;;  %v1149_v32 = vpop.eup %1148  ;;  %1160 = vrcp.f32 %v665_v14  ;;  %v642_v33 = vadd.f32 1.0, %v1147_v25  ;;  %v1465_v56 = vadd.f32 %v1321_v24, %v478_v30  ;;  %v563_v38 = vsub.f32 0.0, %v1459_v26 }
  0xe4   : > { %v1468_v34 = vadd.f32 %v1321_v24, %v498_v31  ;;  %v1151_v37 = vpop.eup %1150  ;;  %752 = vst [vmem:[%s1364_s18 + $0x98] sm:$0xff] %v720_v23  ;;  %v650_v49 = vadd.f32 1.0, %v1149_v32  ;;  %1162 = vpow2.f32 %v631_v12  ;;  %v571_v41 = vsub.f32 0.0, %v1462_v29 }
  0xe5   : > { %v1153_v59 = vpop.eup %1152  ;;  %v728_v42 = vmul.f32 %v1151_v37, %v1392_v50  ;;  %1164 = vrcp.f32 %v642_v33  ;;  %v548_v43 = vsub.f32 0.0, %v1465_v56  ;;  %v617_v47 = vmul.f32 1.442695, %v563_v38 }
  0xe6   : > { %v556_v44 = vsub.f32 0.0, %v1468_v34  ;;  %v1155_v45 = vpop.eup %1154  ;;  %v705_v46 = vmul.f32 %v1153_v59, %v1396_v53  ;;  %1166 = vrcp.f32 %v650_v49  ;;  %v633_v51 = vmul.f32 1.442695, %v571_v41 }
  0xe7   : > { %v1157_v48 = vpop.eup %1156  ;;  %760 = vst [vmem:[%s1364_s18 + $0xd8] sm:$0xff] %v728_v42  ;;  %v658_v35 = vadd.f32 1.0, %v1155_v45  ;;  %1168 = vpow2.f32 %v585_v15  ;;  %v587_v36 = vmul.f32 1.442695, %v548_v43 }
  0xe8   : > { %v1159_v52 = vpop.eup %1158  ;;  %737 = vst [vmem:[%s1364_s18 + $0x20] sm:$0xff] %v705_v46  ;;  %v713_v50 = vmul.f32 %v1157_v48, %v1399_v54  ;;  %1170 = vpow2.f32 %v601_v18  ;;  %v603_v53 = vmul.f32 1.442695, %v556_v44  ;;  %v518_v61 = vpop.f32.mrf.mxu2 }
  0xe9   : > { %v1161_v57 = vpop.eup %1160  ;;  %v721_v58 = vmul.f32 %v1159_v52, %v1412_v19  ;;  %1172 = vrcp.f32 %v658_v35  ;;  %v538_v62 = vpop.f32.mrf.mxu3  ;;  %v1484_v2 = vadd.f32 %v1321_v24, %v518_v61 }
  0xea   : > { %v1163_v17 = vpop.eup %1162  ;;  %745 = vst [vmem:[%s1364_s18 + $0x60] sm:$0xff] %v713_v50  ;;  %v729_v1 = vmul.f32 %v1161_v57, %v1415_v20  ;;  %1174 = vpow2.f32 %v617_v47  ;;  %v1487_v54 = vadd.f32 %v1321_v24, %v538_v62 }
  0xeb   : > { %v1165_v3 = vpop.eup %1164  ;;  %753 = vst [vmem:[%s1364_s18 + $0xa0] sm:$0xff] %v721_v58  ;;  %v666_v19 = vadd.f32 1.0, %v1163_v17  ;;  %1176 = vpow2.f32 %v633_v51  ;;  %v564_v20 = vsub.f32 0.0, %v1484_v2 }
  0xec   : > { %v1167_v4 = vpop.eup %1166  ;;  %761 = vst [vmem:[%s1364_s18 + $0xe0] sm:$0xff] %v729_v1  ;;  %v706_v5 = vmul.f32 %v1165_v3, %v1419_v27  ;;  %1178 = vpow2.f32 %v587_v36  ;;  %v572_v8 = vsub.f32 0.0, %v1487_v54 }
  0xed   : > { %v1169_v22 = vpop.eup %1168  ;;  %v714_v39 = vmul.f32 %v1167_v4, %v1422_v28  ;;  %1180 = vrcp.f32 %v666_v19  ;;  %v619_v7 = vmul.f32 1.442695, %v564_v20 }
  0xee   : > { %v1171_v6 = vpop.eup %1170  ;;  %738 = vst [vmem:[%s1364_s18 + $0x28] sm:$0xff] %v706_v5  ;;  %v643_v24 = vadd.f32 1.0, %v1169_v22  ;;  %1182 = vpow2.f32 %v603_v53  ;;  %v635_v14 = vmul.f32 1.442695, %v572_v8 }
  0xef   : > { %v1173_v9 = vpop.eup %1172  ;;  %746 = vst [vmem:[%s1364_s18 + $0x68] sm:$0xff] %v714_v39  ;;  %v651_v40 = vadd.f32 1.0, %v1171_v6 }
  0xf0   : > { %v1175_v10 = vpop.eup %1174  ;;  %v722_v27 = vmul.f32 %v1173_v9, %v1437_v60  ;;  %1184 = vrcp.f32 %v643_v24 }
  0xf1   : > { %v1177_v11 = vpop.eup %1176  ;;  %1186 = vrcp.f32 %v651_v40  ;;  %v659_v28 = vadd.f32 1.0, %v1175_v10 }
  0xf2   : > { %v1179_v12 = vpop.eup %1178  ;;  %754 = vst [vmem:[%s1364_s18 + $0xa8] sm:$0xff] %v722_v27  ;;  %v667_v13 = vadd.f32 1.0, %v1177_v11  ;;  %1188 = vpow2.f32 %v619_v7 }
  0xf3   : > { %v1181_v15 = vpop.eup %1180  ;;  %1190 = vrcp.f32 %v659_v28  ;;  %v644_v18 = vadd.f32 1.0, %v1179_v12 }
  0xf4   : > { %v1183_v55 = vpop.eup %1182  ;;  %v730_v21 = vmul.f32 %v1181_v15, %v1440_v16  ;;  %1192 = vrcp.f32 %v667_v13 }
  0xf5   : > { %1194 = vrcp.f32 %v644_v18  ;;  %v652_v60 = vadd.f32 1.0, %v1183_v55 }
  0xf6   : > { %v1185_v25 = vpop.eup %1184  ;;  %762 = vst [vmem:[%s1364_s18 + $0xe8] sm:$0xff] %v730_v21  ;;  %1196 = vpow2.f32 %v635_v14 }
  0xf7   : > { %v1187_v23 = vpop.eup %1186  ;;  %v707_v30 = vmul.f32 %v1185_v25, %v1444_v63  ;;  %1198 = vrcp.f32 %v652_v60 }
  0xf8   : > { %v1189_v31 = vpop.eup %1188  ;;  %v715_v32 = vmul.f32 %v1187_v23, %v1447_v0 }
  0xf9   : > { %v1191_v33 = vpop.eup %1190  ;;  %739 = vst [vmem:[%s1364_s18 + $0x30] sm:$0xff] %v707_v30  ;;  %v660_v16 = vadd.f32 1.0, %v1189_v31 }
  0xfa   : > { %v1193_v37 = vpop.eup %1192  ;;  %747 = vst [vmem:[%s1364_s18 + $0x70] sm:$0xff] %v715_v32  ;;  %v723_v49 = vmul.f32 %v1191_v33, %v1459_v26 }
  0xfb   : > { %v1195_v38 = vpop.eup %1194  ;;  %v731_v41 = vmul.f32 %v1193_v37, %v1462_v29  ;;  %1200 = vrcp.f32 %v660_v16 }
  0xfc   : > { %v1197_v63 = vpop.eup %1196  ;;  %755 = vst [vmem:[%s1364_s18 + $0xb0] sm:$0xff] %v723_v49  ;;  %v708_v59 = vmul.f32 %v1195_v38, %v1465_v56 }
  0xfd   : > { %v1199_v0 = vpop.eup %1198  ;;  %763 = vst [vmem:[%s1364_s18 + $0xf0] sm:$0xff] %v731_v41  ;;  %v668_v42 = vadd.f32 1.0, %v1197_v63 }
  0xfe   : > { %740 = vst [vmem:[%s1364_s18 + $0x38] sm:$0xff] %v708_v59  ;;  %v716_v43 = vmul.f32 %v1199_v0, %v1468_v34 }
  0xff   : > { %1202 = vrcp.f32 %v668_v42 }
 0x100   : > { %748 = vst [vmem:[%s1364_s18 + $0x78] sm:$0xff] %v716_v43 }
 0x101   : > { %v1201_v44 = vpop.eup %1200 }
 0x102   : > { %v724_v26 = vmul.f32 %v1201_v44, %v1484_v2 }
 0x104   : > { %756 = vst [vmem:[%s1364_s18 + $0xb8] sm:$0xff] %v724_v26 }
 0x105   : > { %v1203_v45 = vpop.eup %1202 }
 0x106   : > { %v732_v29 = vmul.f32 %v1203_v45, %v1487_v54 }
 0x108   : > { %764 = vst [vmem:[%s1364_s18 + $0xf8] sm:$0xff] %v732_v29 }
 0x109 PF: > { %s13_s14 = sadd.s32 1, %s1226_s14   ;;  %s1530_s12 = smov %s1222_s13 }
 0x10a   : > { %p10_p5 = scmp.ge.s32.totalorder %s13_s14, 4   ;;  %s1531_s13 = smov %s1533_s15 }
 0x10c   :  { %12 = sbr.rel (!%p10_p5) target bundleno = 2 (0x2), region = 68 }

</bundles_post_ra>
